<compile_context>
chip_gen: v5e
topology: v5e:2x2
jax: 0.10.0
libtpu: 0.0.40
codegen_flags: <defaults>
</compile_context>

<pallas_src>
import jax
import jax.numpy as jnp
from jax.experimental import pallas as pl
from jax.experimental.pallas import tpu as pltpu


def _round_up(x, m):
    return ((x + m - 1) // m) * m


def hm_extended_kernel(x_ref, wt_ref, bt_ref, rbias_ref, out_ref):
    # x_ref:     (TB, 5E)   bf16  streamed per row tile
    # wt_ref:    (2E, 5E)   bf16  VMEM-resident fused/transposed block-diag weight
    # bt_ref:    (2E, 1)    f32   VMEM-resident MLP bias column
    # rbias_ref: (1, 1, TB) f32   lane-dense combined customer+article bias
    # out_ref:   (1, 1, TB) f32   lane-dense output row
    e2 = wt_ref.shape[0]          # 2E
    e = e2 // 2
    # Fused block-diagonal MLP, computed transposed so the batch lands on the
    # lane axis: (2E, 5E) x (TB, 5E)^T -> (2E, TB), f32 accumulation on MXU.
    h_t = jax.lax.dot_general(
        wt_ref[...], x_ref[...],
        dimension_numbers=(((1,), (1,)), ((), ())),
        preferred_element_type=jnp.float32)
    h_t = jax.nn.sigmoid(h_t + bt_ref[...])                  # (2E, TB)
    cust_t = h_t[:e, :]                                       # sublane halves (E, TB)
    art_t = h_t[e:, :]
    dot = jnp.sum(cust_t * art_t, axis=0, keepdims=True)      # (1, TB) sublane reduce
    out_ref[0] = jax.nn.sigmoid(dot + rbias_ref[0])


def hm_extended_forward(row, params, *, block_rows=8192):
    """row: (B, 5) int32 columns = [customer, article, age, garment_group, index_group]."""
    customer = row[:, 0]
    article = row[:, 1]
    age = row[:, 2]
    garment_group = row[:, 3]
    index_group = row[:, 4]

    # Index preprocessing (same arithmetic as the PyTorch forward).
    age = jnp.where(age < 0, 36, age)
    garment_group = garment_group - 1001
    index_group = index_group - 1
    age = age - 1

    E = params["customer_embed"].shape[1]

    # Embedding gathers + concat into one fused (B, 5E) bf16 stream.  With
    # allow_input_fusion below, XLA may sink this gather/concat/cast directly
    # into the pallas_call operand instead of materializing it in HBM.
    x = jnp.concatenate(
        [params["customer_embed"][customer],
         params["age_embed"][age],
         params["article_embed"][article],
         params["indexgroup_embed"][index_group],
         params["garmentgroup_embed"][garment_group]], axis=1
    ).astype(jnp.bfloat16)                                            # (B, 5E)

    # Combined per-row bias stream (becomes a lane-dense (G, 1, TB) operand).
    rbias = (params["customer_bias"][customer][:, 0]
             + params["article_bias"][article][:, 0]).astype(jnp.float32)  # (B,)

    # Block-diagonal fused weight, stored TRANSPOSED: [Wc 0; 0 Wa]^T -> (2E, 5E).
    W = jnp.zeros((5 * E, 2 * E), jnp.float32)
    W = W.at[:2 * E, :E].set(params["Wc"]).at[2 * E:, E:].set(params["Wa"])
    Wt = W.T.astype(jnp.bfloat16)                                     # (2E, 5E)
    bt = jnp.concatenate(
        [params["bc"], params["ba"]], axis=1).T.astype(jnp.float32)   # (2E, 1)

    B = row.shape[0]
    # Row tile: multiple of 128 so the transposed output/rbias rows are lane-dense.
    TB = min(block_rows, _round_up(B, 128))
    # v7x has 2 TensorCores: if the grid would collapse to one step but the
    # batch is big enough, halve the tile so the "parallel" axis can shard.
    if TB > 128 and _round_up(B, TB) == TB:
        TB = _round_up((TB + 1) // 2, 128)
    B_pad = _round_up(B, TB)
    G = B_pad // TB

    if B_pad != B:
        x = jnp.pad(x, ((0, B_pad - B), (0, 0)))
        rbias = jnp.pad(rbias, (0, B_pad - B))
    rbias = rbias.reshape(G, 1, TB)   # contiguous, free

    out = pl.pallas_call(
        hm_extended_kernel,
        out_shape=jax.ShapeDtypeStruct((G, 1, TB), jnp.float32),
        grid_spec=pltpu.PrefetchScalarGridSpec(
            num_scalar_prefetch=0,
            grid=(G,),
            in_specs=[
                pl.BlockSpec((TB, 5 * E), lambda i: (i, 0)),      # streamed activations
                pl.BlockSpec((2 * E, 5 * E), lambda i: (0, 0)),   # VMEM-resident weight
                pl.BlockSpec((2 * E, 1), lambda i: (0, 0)),       # VMEM-resident MLP bias
                pl.BlockSpec((1, 1, TB), lambda i: (i, 0, 0)),    # lane-dense row bias
            ],
            out_specs=pl.BlockSpec((1, 1, TB), lambda i: (i, 0, 0)),
        ),
        compiler_params=pltpu.CompilerParams(
            dimension_semantics=("parallel",),
            allow_input_fusion=[True, False, False, True],
            vmem_limit_bytes=48 * 1024 * 1024),
    )(x, Wt, bt, rbias)
    return out.reshape(B_pad, 1)[:B]


def hm_extended_reference(row, params):
    """Pure-JAX reference matching the kernel's bf16 streaming quantization."""
    customer = row[:, 0]
    article = row[:, 1]
    age = jnp.where(row[:, 2] < 0, 36, row[:, 2]) - 1
    garment_group = row[:, 3] - 1001
    index_group = row[:, 4] - 1

    cust_in = jnp.concatenate(
        [params["customer_embed"][customer], params["age_embed"][age]], axis=1)
    art_in = jnp.concatenate(
        [params["article_embed"][article],
         params["indexgroup_embed"][index_group],
         params["garmentgroup_embed"][garment_group]], axis=1)

    q = lambda a: a.astype(jnp.bfloat16).astype(jnp.float32)
    cust = jax.nn.sigmoid(q(cust_in) @ q(params["Wc"]) + params["bc"])
    art = jax.nn.sigmoid(q(art_in) @ q(params["Wa"]) + params["ba"])
    dot = jnp.sum(cust * art, axis=1, keepdims=True)
    return jax.nn.sigmoid(dot + params["customer_bias"][customer]
                          + params["article_bias"][article])


def init_params(key, num_customer, num_articles, num_age, num_idxgroup,
                num_garmentgroup, embedding_size):
    ks = jax.random.split(key, 12)
    E = embedding_size
    n = jax.random.normal
    u = jax.random.uniform

    def lin(kw, kb, fan_in, fan_out):
        bound = 1.0 / jnp.sqrt(fan_in)
        W = u(kw, (fan_in, fan_out), jnp.float32, -bound, bound)   # stored as PyTorch W^T
        b = u(kb, (1, fan_out), jnp.float32, -bound, bound)
        return W, b

    Wc, bc = lin(ks[6], ks[7], 2 * E, E)
    Wa, ba = lin(ks[8], ks[9], 3 * E, E)
    return {
        "customer_embed": n(ks[0], (num_customer, E), jnp.float32),
        "article_embed": n(ks[1], (num_articles, E), jnp.float32),
        "age_embed": n(ks[2], (num_age, E), jnp.float32),
        "indexgroup_embed": n(ks[3], (num_idxgroup, E), jnp.float32),
        "garmentgroup_embed": n(ks[4], (num_garmentgroup, E), jnp.float32),
        "customer_bias": n(ks[5], (num_customer, 1), jnp.float32),
        "article_bias": n(ks[10], (num_articles, 1), jnp.float32),
        "Wc": Wc, "bc": bc, "Wa": Wa, "ba": ba,
    }


if __name__ == "__main__":
    B = 8
    E = 32
    num_customer, num_articles = 16, 16
    num_age, num_idxgroup, num_garmentgroup = 64, 8, 8

    key = jax.random.PRNGKey(0)
    kp, k1, k2, k3, k4, k5 = jax.random.split(key, 6)
    params = init_params(kp, num_customer, num_articles, num_age,
                         num_idxgroup, num_garmentgroup, E)

    customer = jax.random.randint(k1, (B,), 0, num_customer, jnp.int32)
    article = jax.random.randint(k2, (B,), 0, num_articles, jnp.int32)
    # raw ages >= 1 (valid indices after the -1 shift); a couple of negative
    # entries exercise the `age < 0 -> 36` branch.
    age = jax.random.randint(k3, (B,), 1, num_age + 1, jnp.int32)
    age = age.at[0].set(-3).at[3].set(-1)
    garment_group = jax.random.randint(k4, (B,), 0, num_garmentgroup, jnp.int32) + 1001
    index_group = jax.random.randint(k5, (B,), 0, num_idxgroup, jnp.int32) + 1
    row = jnp.stack([customer, article, age, garment_group, index_group], axis=1)

    out = hm_extended_forward(row, params)
    jax.block_until_ready(out)
    assert out.shape == (B, 1) and out.dtype == jnp.float32

    ref = hm_extended_reference(row, params)
    assert jnp.allclose(out, ref, atol=5e-3, rtol=5e-3), (out, ref)
    print("KERNEL_OK")
</pallas_src>

<mosaic_0001>
module attributes {stable_mosaic.version = 11 : i64} {
  func.func @hm_extended_kernel(%arg0: i32, %arg1: memref<128x160xbf16, #tpu.memory_space<vmem>>, %arg2: memref<64x160xbf16, #tpu.memory_space<vmem>>, %arg3: memref<64x1xf32, #tpu.memory_space<vmem>>, %arg4: memref<1x1x128xf32, #tpu.memory_space<vmem>>, %arg5: memref<1x1x128xf32, #tpu.memory_space<vmem>>) attributes {dimension_semantics = [#tpu.dimension_semantics<parallel>], iteration_bounds = array<i64: 1>, scalar_prefetch = 0 : i64, scratch_operands = 0 : i64, tpu.core_type = #tpu.core_type<tc>, window_params = [{transform_indices = @transform_0, window_bounds = array<i64: 128, 160>}, {pipeline_mode = #tpu.pipeline_mode<synchronous>, transform_indices = @transform_1, window_bounds = array<i64: 64, 160>}, {pipeline_mode = #tpu.pipeline_mode<synchronous>, transform_indices = @transform_2, window_bounds = array<i64: 64, 1>}, {transform_indices = @transform_3, window_bounds = array<i64: 1, 1, 128>}, {transform_indices = @transform_4, window_bounds = array<i64: 1, 1, 128>}]} {
    %c0 = arith.constant 0 : index
    %c0_0 = arith.constant 0 : index
    %0 = vector.load %arg2[%c0, %c0_0] : memref<64x160xbf16, #tpu.memory_space<vmem>>, vector<64x160xbf16>
    %c0_1 = arith.constant 0 : index
    %c0_2 = arith.constant 0 : index
    %1 = vector.load %arg1[%c0_1, %c0_2] : memref<128x160xbf16, #tpu.memory_space<vmem>>, vector<128x160xbf16>
    %cst = arith.constant dense<0.000000e+00> : vector<64x128xf32>
    %2 = tpu.matmul %0, %1, %cst {dimension_numbers = #tpu.dot_dimension_numbers<[1], [1], [0], [0], [0, 0, 1, 0], [], []>} : vector<64x160xbf16>, vector<128x160xbf16>, vector<64x128xf32> -> vector<64x128xf32>
    %c0_3 = arith.constant 0 : index
    %c0_4 = arith.constant 0 : index
    %3 = vector.load %arg3[%c0_3, %c0_4] : memref<64x1xf32, #tpu.memory_space<vmem>>, vector<64x1xf32>
    %4 = vector.broadcast %3 : vector<64x1xf32> to vector<64x128xf32>
    %5 = arith.addf %2, %4 : vector<64x128xf32>
    %6 = arith.negf %5 : vector<64x128xf32>
    %7 = math.exp %6 : vector<64x128xf32>
    %cst_5 = arith.constant 1.000000e+00 : f32
    %8 = vector.broadcast %cst_5 : f32 to vector<64x128xf32>
    %9 = arith.addf %8, %7 : vector<64x128xf32>
    %10 = arith.divf %8, %9 : vector<64x128xf32>
    %11 = vector.extract_strided_slice %10 {offsets = [0, 0], sizes = [32, 128], strides = [1, 1]} : vector<64x128xf32> to vector<32x128xf32>
    %12 = vector.extract_strided_slice %10 {offsets = [32, 0], sizes = [32, 128], strides = [1, 1]} : vector<64x128xf32> to vector<32x128xf32>
    %13 = arith.mulf %11, %12 : vector<32x128xf32>
    %cst_6 = arith.constant dense<0.000000e+00> : vector<128xf32>
    %14 = vector.multi_reduction <add>, %13, %cst_6 [0] : vector<32x128xf32> to vector<128xf32>
    %15 = vector.shape_cast %14 : vector<128xf32> to vector<1x128xf32>
    %c0_7 = arith.constant 0 : index
    %c0_8 = arith.constant 0 : index
    %c0_9 = arith.constant 0 : index
    %16 = vector.load %arg4[%c0_7, %c0_8, %c0_9] : memref<1x1x128xf32, #tpu.memory_space<vmem>>, vector<1x1x128xf32>
    %17 = vector.shape_cast %16 : vector<1x1x128xf32> to vector<1x128xf32>
    %18 = arith.addf %15, %17 : vector<1x128xf32>
    %19 = arith.negf %18 : vector<1x128xf32>
    %20 = math.exp %19 : vector<1x128xf32>
    %cst_10 = arith.constant 1.000000e+00 : f32
    %21 = vector.broadcast %cst_10 : f32 to vector<1x128xf32>
    %22 = arith.addf %21, %20 : vector<1x128xf32>
    %23 = arith.divf %21, %22 : vector<1x128xf32>
    %c0_11 = arith.constant 0 : index
    %c0_12 = arith.constant 0 : index
    %c0_13 = arith.constant 0 : index
    %24 = vector.load %arg5[%c0_11, %c0_12, %c0_13] : memref<1x1x128xf32, #tpu.memory_space<vmem>>, vector<1x1x128xf32>
    %25 = vector.shape_cast %24 : vector<1x1x128xf32> to vector<1x128xf32>
    %26 = vector.shape_cast %23 : vector<1x128xf32> to vector<1x1x128xf32>
    tpu.vector_store %arg5[%c0_11, %c0_12, %c0_13], %26 {strides = array<i32>} : memref<1x1x128xf32, #tpu.memory_space<vmem>>, vector<1x1x128xf32>,
    return
  }
  func.func @transform_0(%arg0: i32) -> (i32, i32) {
    %c0_i32 = arith.constant 0 : i32
    %c0_i32_0 = arith.constant 0 : i32
    return %arg0, %c0_i32 : i32, i32
  }
  func.func @transform_1(%arg0: i32) -> (i32, i32) {
    %c0_i32 = arith.constant 0 : i32
    %c0_i32_0 = arith.constant 0 : i32
    %c0_i32_1 = arith.constant 0 : i32
    return %c0_i32, %c0_i32_0 : i32, i32
  }
  func.func @transform_2(%arg0: i32) -> (i32, i32) {
    %c0_i32 = arith.constant 0 : i32
    %c0_i32_0 = arith.constant 0 : i32
    %c0_i32_1 = arith.constant 0 : i32
    return %c0_i32, %c0_i32_0 : i32, i32
  }
  func.func @transform_3(%arg0: i32) -> (i32, i32, i32) {
    %c0_i32 = arith.constant 0 : i32
    %c0_i32_0 = arith.constant 0 : i32
    %c0_i32_1 = arith.constant 0 : i32
    return %arg0, %c0_i32, %c0_i32_0 : i32, i32, i32
  }
  func.func @transform_4(%arg0: i32) -> (i32, i32, i32) {
    %c0_i32 = arith.constant 0 : i32
    %c0_i32_0 = arith.constant 0 : i32
    %c0_i32_1 = arith.constant 0 : i32
    return %arg0, %c0_i32, %c0_i32_0 : i32, i32, i32
  }
}

</mosaic_0001>

<bundles_post_ra>
// kernel: tpu_custom_call.1
= control target key start
LH: loop header
LB: loop body
LE: loop exit
PB: predicated region body
PF: predicated region fallthrough
CT: control target
= control target key end

     0   :  { %vm198_vm0 = vcmask 261120   ;;  %s1106_s0 = inlined_call_operand.vmem [shape: bf16[128,160], index: 0, kind: input, shape index: {}]   ;;  %s1107_s1 = inlined_call_operand.vmem [shape: bf16[64,160], index: 1, kind: input, shape index: {}]   ;;  %s1108_s2 = inlined_call_operand.vmem [shape: f32[64,1], index: 2, kind: input, shape index: {}]   ;;  %s1109_s3 = inlined_call_operand.vmem [shape: f32[1,1,128], index: 3, kind: input, shape index: {}]   ;;  %s1110_s4 = inlined_call_operand.hbm [shape: f32[1,1,128], index: 4, kind: output, shape index: {}]  }
   0x1   :  { %v586_v0 = vld [vmem:[%s1106_s0 + $0x70] sm:$0xf]  ;;  %v628_v1 = vld [vmem:[%s1106_s0 + $0x74] sm:$0xf0]  ;;  %v627_v2 = vld [vmem:[%s1106_s0 + $0x74] sm:$0xf] }
   0x2   :  { %v587_v3 = vor.u32 %v628_v1, %v586_v0  ;;  %v588_v4 = vld [vmem:[%s1106_s0 + $0x78] sm:$0xf0]  ;;  %v625_v6 = vld [vmem:[%s1106_s0 + $0x64] sm:$0xf]  ;;  %v580_v7 = vld [vmem:[%s1106_s0 + $0x68] sm:$0xf0] }
   0x3   :  { %v591_v5 = vor.u32 %v627_v2, %v588_v4  ;;  %v578_v9 = vld [vmem:[%s1106_s0 + $0x60] sm:$0xf]  ;;  %v626_v10 = vld [vmem:[%s1106_s0 + $0x64] sm:$0xf0]  ;;  %v583_v11 = vor.u32 %v625_v6, %v580_v7 }
   0x4   :  { %235 = vmatpush.bf16.xpose.msra.mxu0 %v587_v3  ;;  %629 = vmatpush.bf16.xpose.msra.mxu2 %v587_v3  ;;  %v579_v12 = vor.u32 %v626_v10, %v578_v9 }
   0x5   :  { %v233_v8 = vsel %vm198_vm0, %v591_v5, 0 }
   0x6   :  { %264 = vmatpush.bf16.xpose.msra.mxu1 %v233_v8  ;;  %637 = vmatpush.bf16.xpose.msra.mxu3 %v233_v8 }
   0x7   :  { %9 = vsyncpa [#allocation3], 0  ;;  %v230_v13 = vsel %vm198_vm0, %v583_v11, 0  ;;  %v623_v14 = vld [vmem:[%s1106_s0 + $0x54] sm:$0xf]  ;;  %v46_v39 = vld [vmem:[%s1108_s2 + $0x20] sm:$0xff] }
   0x8   :  { %v572_v15 = vld [vmem:[%s1106_s0 + $0x58] sm:$0xf0]  ;;  %v570_v16 = vld [vmem:[%s1106_s0 + $0x50] sm:$0xf]  ;;  %v624_v17 = vld [vmem:[%s1106_s0 + $0x54] sm:$0xf0] }
   0x9   :  { %v575_v18 = vor.u32 %v623_v14, %v572_v15  ;;  %v571_v19 = vor.u32 %v624_v17, %v570_v16  ;;  %v621_v21 = vld [vmem:[%s1106_s0 + $0x44] sm:$0xf]  ;;  %v564_v22 = vld [vmem:[%s1106_s0 + $0x48] sm:$0xf0]  ;;  %v562_v23 = vld [vmem:[%s1106_s0 + $0x40] sm:$0xf] }
   0xa   :  { %v622_v24 = vld [vmem:[%s1106_s0 + $0x44] sm:$0xf0]  ;;  %v567_v25 = vor.u32 %v621_v21, %v564_v22  ;;  %v619_v28 = vld [vmem:[%s1106_s0 + $0x34] sm:$0xf]  ;;  %v556_v29 = vld [vmem:[%s1106_s0 + $0x38] sm:$0xf0] }
   0xb   :  { %v227_v20 = vsel %vm198_vm0, %v575_v18, 0  ;;  %v563_v26 = vor.u32 %v622_v24, %v562_v23  ;;  %v554_v30 = vld [vmem:[%s1106_s0 + $0x30] sm:$0xf]  ;;  %v620_v31 = vld [vmem:[%s1106_s0 + $0x34] sm:$0xf0]  ;;  %v559_v32 = vor.u32 %v619_v28, %v556_v29  ;;  %v42_v40 = vld [vmem:[%s1108_s2] sm:$0xff] }
   0xc   :  { %236 = vmatpush.bf16.xpose.msra.mxu0 %v579_v12  ;;  %630 = vmatpush.bf16.xpose.msra.mxu2 %v579_v12  ;;  %v224_v27 = vsel %vm198_vm0, %v567_v25, 0  ;;  %v555_v33 = vor.u32 %v620_v31, %v554_v30  ;;  %v546_v35 = vld [vmem:[%s1106_s0 + $0x20] sm:$0xf]  ;;  %v617_v36 = vld [vmem:[%s1106_s0 + $0x24] sm:$0xf]  ;;  %v712_v42 = vmov 0  }
   0xd   :  { %v221_v34 = vsel %vm198_vm0, %v559_v32, 0  ;;  %v548_v37 = vld [vmem:[%s1106_s0 + $0x28] sm:$0xf0]  ;;  %v618_v38 = vld [vmem:[%s1106_s0 + $0x24] sm:$0xf0]  ;;  %648 = vset.pattern.permute.xlu1 %v712_v42  ;;  %647 = vset.pattern.permute.xlu0 %v712_v42  ;;  %v44_v58 = vld [vmem:[%s1108_s2 + $0x10] sm:$0xff] }
   0xe   :  { %265 = vmatpush.bf16.xpose.msra.mxu1 %v230_v13  ;;  %638 = vmatpush.bf16.xpose.msra.mxu3 %v230_v13  ;;  %v551_v41 = vor.u32 %v617_v36, %v548_v37  ;;  %v547_v43 = vor.u32 %v618_v38, %v546_v35  ;;  %v615_v45 = vld [vmem:[%s1106_s0 + $0x14] sm:$0xf]  ;;  %v540_v46 = vld [vmem:[%s1106_s0 + $0x18] sm:$0xf0]  ;;  %v538_v47 = vld [vmem:[%s1106_s0 + $0x10] sm:$0xf] }
   0xf   :  { %72 = vperm.xlu1 %648, %v46_v39   ;;  %52 = vperm.xlu0 %647, %v42_v40   ;;  %v616_v48 = vld [vmem:[%s1106_s0 + $0x14] sm:$0xf0]  ;;  %v543_v49 = vor.u32 %v615_v45, %v540_v46  ;;  %v47_v52 = vld [vmem:[%s1108_s2 + $0x28] sm:$0xff]  ;;  %v613_v54 = vld [vmem:[%s1106_s0 + $0x4] sm:$0xf]  ;;  %s713_s21 = smov [#allocation2]  }
  0x10   :  { %649 = vset.pattern.permute.xlu2 %v712_v42  ;;  %v218_v44 = vsel %vm198_vm0, %v551_v41, 0  ;;  %v539_v50 = vor.u32 %v616_v48, %v538_v47  ;;  %v43_v53 = vld [vmem:[%s1108_s2 + $0x8] sm:$0xff]  ;;  %v530_v56 = vld [vmem:[%s1106_s0] sm:$0xf]  ;;  %v49_v61 = vld [vmem:[%s1108_s2 + $0x38] sm:$0xff]  ;;  %s485_s22 = sshll.u32 %s713_s21, 4  ;;  %s486_s22 = int_to_ptr.vmem [resolvable:$true] %s485_s22 }
  0x11   :  { %v215_v51 = vsel %vm198_vm0, %v543_v49, 0  ;;  %v532_v55 = vld [vmem:[%s1106_s0 + $0x8] sm:$0xf0]  ;;  %v614_v57 = vld [vmem:[%s1106_s0 + $0x4] sm:$0xf0]  ;;  %62 = vperm.xlu2 %649, %v44_v58   ;;  %v45_v62 = vld [vmem:[%s1108_s2 + $0x18] sm:$0xff] }
  0x12   :  { %v535_v59 = vor.u32 %v613_v54, %v532_v55  ;;  %v531_v60 = vor.u32 %v614_v57, %v530_v56  ;;  %v498_v0 = vld [vmem:[%s1107_s1] sm:$0xf]  ;;  %v606_v1 = vld [vmem:[%s1107_s1 + $0x4] sm:$0xf0]  ;;  %v48_v4 = vld [vmem:[%s1108_s2 + $0x30] sm:$0xff] }
  0x13   :  { %v514_v2 = vld [vmem:[%s1107_s1 + $0x20] sm:$0xf]  ;;  %v610_v3 = vld [vmem:[%s1107_s1 + $0x24] sm:$0xf0]  ;;  %v605_v5 = vld [vmem:[%s1107_s1 + $0x4] sm:$0xf]  ;;  %v499_v9 = vor.u32 %v606_v1, %v498_v0 }
  0x14   :  { %237 = vmatpush.bf16.xpose.msra.mxu0 %v571_v19  ;;  %631 = vmatpush.bf16.xpose.msra.mxu2 %v571_v19  ;;  %v212_v63 = vsel %vm198_vm0, %v535_v59, 0  ;;  %v500_v6 = vld [vmem:[%s1107_s1 + $0x8] sm:$0xf0]  ;;  %v609_v7 = vld [vmem:[%s1107_s1 + $0x24] sm:$0xf]  ;;  %v515_v10 = vor.u32 %v610_v3, %v514_v2 }
  0x15   :  { %v516_v8 = vld [vmem:[%s1107_s1 + $0x28] sm:$0xf0]  ;;  %v503_v11 = vor.u32 %v605_v5, %v500_v6  ;;  %v506_v13 = vld [vmem:[%s1107_s1 + $0x10] sm:$0xf]  ;;  %v608_v14 = vld [vmem:[%s1107_s1 + $0x14] sm:$0xf0] }
  0x16   :  { %266 = vmatpush.bf16.xpose.msra.mxu1 %v227_v20  ;;  %639 = vmatpush.bf16.xpose.msra.mxu3 %v227_v20  ;;  %v519_v12 = vor.u32 %v609_v7, %v516_v8  ;;  %v522_v15 = vld [vmem:[%s1107_s1 + $0x30] sm:$0xf]  ;;  %v612_v16 = vld [vmem:[%s1107_s1 + $0x34] sm:$0xf0]  ;;  %v607_v17 = vld [vmem:[%s1107_s1 + $0x14] sm:$0xf]  ;;  %v507_v21 = vor.u32 %v608_v14, %v506_v13 }
  0x17   :  { %77 = vperm.xlu1 %648, %v47_v52   ;;  %57 = vperm.xlu0 %647, %v43_v53   ;;  %v508_v18 = vld [vmem:[%s1107_s1 + $0x18] sm:$0xf0]  ;;  %v611_v19 = vld [vmem:[%s1107_s1 + $0x34] sm:$0xf]  ;;  %v523_v22 = vor.u32 %v612_v16, %v522_v15 }
  0x18   :  { %v524_v20 = vld [vmem:[%s1107_s1 + $0x38] sm:$0xf0]  ;;  %v511_v23 = vor.u32 %v607_v17, %v508_v18 }
  0x19   :  { %82 = vperm.xlu2 %649, %v48_v4   ;;  %v527_v24 = vor.u32 %v611_v19, %v524_v20 }
  0x1c   :  { %238 = vmatpush.bf16.xpose.msra.mxu0 %v563_v26  ;;  %632 = vmatpush.bf16.xpose.msra.mxu2 %v563_v26 }
  0x1e   :  { %267 = vmatpush.bf16.xpose.msra.mxu1 %v224_v27  ;;  %640 = vmatpush.bf16.xpose.msra.mxu3 %v224_v27 }
  0x1f   :  { %87 = vperm.xlu1 %648, %v49_v61   ;;  %67 = vperm.xlu0 %647, %v45_v62  }
  0x24   :  { %239 = vmatpush.bf16.xpose.msra.mxu0 %v555_v33  ;;  %633 = vmatpush.bf16.xpose.msra.mxu2 %v555_v33 }
  0x26   :  { %268 = vmatpush.bf16.xpose.msra.mxu1 %v221_v34  ;;  %641 = vmatpush.bf16.xpose.msra.mxu3 %v221_v34 }
  0x2c   :  { %240 = vmatpush.bf16.xpose.msra.mxu0 %v547_v43  ;;  %634 = vmatpush.bf16.xpose.msra.mxu2 %v547_v43 }
  0x2e   :  { %269 = vmatpush.bf16.xpose.msra.mxu1 %v218_v44  ;;  %642 = vmatpush.bf16.xpose.msra.mxu3 %v218_v44 }
  0x34   :  { %241 = vmatpush.bf16.xpose.msra.mxu0 %v539_v50  ;;  %635 = vmatpush.bf16.xpose.msra.mxu2 %v539_v50 }
  0x36   :  { %270 = vmatpush.bf16.xpose.msra.mxu1 %v215_v51  ;;  %643 = vmatpush.bf16.xpose.msra.mxu3 %v215_v51 }
  0x3c   :  { %242 = vmatpush.bf16.xpose.msra.mxu0 %v531_v60  ;;  %636 = vmatpush.bf16.xpose.msra.mxu2 %v531_v60 }
  0x3e   :  { %271 = vmatpush.bf16.xpose.msra.mxu1 %v212_v63  ;;  %644 = vmatpush.bf16.xpose.msra.mxu3 %v212_v63 }
  0x43   :  { %243 = vmatmul.bf16.vlgmr.msra.gmra.mxu0 %v499_v9  ;;  %253 = vmatmul.bf16.vlgmr.msra.gmra.mxu2 %v515_v10 }
  0x45   :  { %592 = vmatmul.msk.bf16.vlgmr.msra.gmra.mxu1 %vm198_vm0, %v503_v11  ;;  %594 = vmatmul.msk.bf16.vlgmr.msra.gmra.mxu3 %vm198_vm0, %v519_v12 }
  0x53   :  { %248 = vmatmul.bf16.gmra.mxu0 %v507_v21  ;;  %258 = vmatmul.bf16.gmra.mxu2 %v523_v22 }
  0x55   :  { %593 = vmatmul.msk.bf16.gmra.mxu1 %vm198_vm0, %v511_v23  ;;  %595 = vmatmul.msk.bf16.gmra.mxu3 %vm198_vm0, %v527_v24 }
  0x6b   :  { %v63_v43 = vpop.permute.xlu2 %62 }
  0x73   :  { %v83_v60 = vpop.permute.xlu2 %82 }
  0x81   :  { %v53_v25 = vpop.permute.xlu0 %52  ;;  %v73_v29 = vpop.permute.xlu1 %72 }
  0x89   :  { %v58_v32 = vpop.permute.xlu0 %57  ;;  %v78_v44 = vpop.permute.xlu1 %77 }
  0x91   :  { %v68_v2 = vpop.permute.xlu0 %67  ;;  %v88_v16 = vpop.permute.xlu1 %87 }
  0xc0   :  { %v244_v26 = vpop.f32.mrf.mxu0 }
  0xc1   :  { %v245_v27 = vadd.f32 %v244_v26, %v53_v25 }
  0xc2   :  { %v273_v28 = vpop.f32.mrf.mxu1 }
  0xc3   :  { %v274_v30 = vadd.f32 %v273_v28, %v245_v27 }
  0xc5   :  { %v596_v34 = vmul.f32 -1.442695, %v274_v30 }
  0xc6   :  { %v254_v31 = vpop.f32.mrf.mxu2 }
  0xc7   :  { %v255_v33 = vadd.f32 %v254_v31, %v73_v29  ;;  %650 = vpow2.f32 %v596_v34 }
  0xc8   :  { %v283_v35 = vpop.f32.mrf.mxu3  ;;  %v246_v36 = vpop.f32.mrf.mxu0 }
  0xc9   :  { %v284_v37 = vadd.f32 %v283_v35, %v255_v33  ;;  %v247_v38 = vadd.f32 %v246_v36, %v58_v32 }
  0xca   :  { %v275_v39 = vpop.f32.mrf.mxu1 }
  0xcb   :  { %v600_v40 = vmul.f32 -1.442695, %v284_v37  ;;  %v276_v41 = vadd.f32 %v275_v39, %v247_v38 }
  0xcd   :  { %v597_v42 = vmul.f32 -1.442695, %v276_v41  ;;  %652 = vpow2.f32 %v600_v40  ;;  %v651_v51 = vpop.eup %650 }
  0xce   :  { %v256_v45 = vpop.f32.mrf.mxu2  ;;  %v919_v56 = vadd.f32 1.0, %v651_v51 }
  0xcf   :  { %v257_v46 = vadd.f32 %v256_v45, %v78_v44  ;;  %654 = vpow2.f32 %v597_v42 }
  0xd0   :  { %v285_v47 = vpop.f32.mrf.mxu3  ;;  %v249_v48 = vpop.f32.mrf.mxu0  ;;  %v334_v31 = vand.u32 2147483647, %v919_v56  ;;  %v336_v34 = vand.u32 2147483648, %v919_v56  ;;  %vm330_vm1 = vweird.f32 %v919_v56 }
  0xd1   :  { %v286_v49 = vadd.f32 %v285_v47, %v257_v46  ;;  %v250_v50 = vadd.f32 %v249_v48, %v63_v43 }
  0xd2   :  { %v278_v52 = vpop.f32.mrf.mxu1  ;;  %vm965_vm2 = vcmp.eq.f32.partialorder %v334_v31, 8.507059e+37  ;;  %v337_v47 = vor.u32 1.1754944e-38, %v336_v34 }
  0xd3   :  { %v601_v53 = vmul.f32 -1.442695, %v286_v49  ;;  %v279_v54 = vadd.f32 %v278_v52, %v250_v50  ;;  %v653_v55 = vpop.eup %652 }
  0xd4   :  { %v921_v61 = vadd.f32 1.0, %v653_v55 }
  0xd5   :  { %656 = vpow2.f32 %v601_v53  ;;  %v598_v57 = vmul.f32 -1.442695, %v279_v54  ;;  %v655_v58 = vpop.eup %654 }
  0xd6   :  { %v259_v59 = vpop.f32.mrf.mxu2  ;;  %v924_v1 = vadd.f32 1.0, %v655_v58  ;;  %v396_v36 = vand.u32 2147483648, %v921_v61  ;;  %v394_v43 = vand.u32 2147483647, %v921_v61  ;;  %vm390_vm4 = vweird.f32 %v921_v61 }
  0xd7   :  { %658 = vpow2.f32 %v598_v57  ;;  %v260_v62 = vadd.f32 %v259_v59, %v83_v60 }
  0xd8   :  { %v288_v63 = vpop.f32.mrf.mxu3  ;;  %v251_v0 = vpop.f32.mrf.mxu0  ;;  %660 = vrcp.f32 %v919_v56  ;;  %v351_v39 = vand.u32 2147483648, %v924_v1  ;;  %v349_v44 = vand.u32 2147483647, %v924_v1  ;;  %v397_v49 = vor.u32 1.1754944e-38, %v396_v36 }
  0xd9   :  { %v289_v3 = vadd.f32 %v288_v63, %v260_v62  ;;  %v252_v4 = vadd.f32 %v251_v0, %v68_v2  ;;  %662 = vrcp.f32 %v921_v61  ;;  %vm345_vm5 = vweird.f32 %v924_v1 }
  0xda   :  { %v280_v6 = vpop.f32.mrf.mxu1  ;;  %664 = vrcp.f32 %v924_v1  ;;  %v352_v53 = vor.u32 1.1754944e-38, %v351_v39  ;;  %vm990_vm8 = vcmp.eq.f32.partialorder %v394_v43, 8.507059e+37  ;;  %vm994_vm9 = vcmp.eq.f32.partialorder %v349_v44, 8.507059e+37 }
  0xdb   :  { %v657_v5 = vpop.eup %656  ;;  %v602_v8 = vmul.f32 -1.442695, %v289_v3  ;;  %v281_v10 = vadd.f32 %v280_v6, %v252_v4 }
  0xdc   :  { %v927_v7 = vadd.f32 1.0, %v657_v5 }
  0xdd   :  { %v659_v9 = vpop.eup %658  ;;  %v599_v17 = vmul.f32 -1.442695, %v281_v10 }
  0xde   :  { %666 = vrcp.f32 %v927_v7  ;;  %v931_v11 = vpop.eup %660  ;;  %v933_v12 = vadd.f32 1.0, %v659_v9  ;;  %v261_v13 = vpop.f32.mrf.mxu2  ;;  %v409_v60 = vand.u32 2147483647, %v927_v7  ;;  %vm405_vm10 = vweird.f32 %v927_v7 }
  0xdf   :  { %668 = vpow2.f32 %v602_v8  ;;  %v935_v14 = vpop.eup %662  ;;  %v326_v15 = vmul.f32 %v931_v11, %v919_v56  ;;  %v262_v20 = vadd.f32 %v261_v13, %v88_v16  ;;  %vm331_vm3 = vweird.f32 %v931_v11 }
  0xe0   :  { %v290_v18 = vpop.f32.mrf.mxu3  ;;  %v939_v19 = vpop.eup %664  ;;  %670 = vrcp.f32 %v933_v12  ;;  %v386_v25 = vmul.f32 %v935_v14, %v921_v61  ;;  %vm985_vm6 = vmor %vm330_vm1, %vm331_vm3  ;;  %vm391_vm7 = vweird.f32 %v935_v14  ;;  %v411_v2 = vand.u32 2147483648, %v927_v7 }
  0xe1   :  { %672 = vpow2.f32 %v599_v17  ;;  %v291_v23 = vadd.f32 %v290_v18, %v262_v20  ;;  %v327_v24 = vsub.f32 1.0, %v326_v15  ;;  %v341_v27 = vmul.f32 %v939_v19, %v924_v1  ;;  %vm1024_vm13 = vmor %vm390_vm4, %vm391_vm7 }
  0xe2   :  { %v387_v35 = vsub.f32 1.0, %v386_v25  ;;  %vm346_vm11 = vweird.f32 %v939_v19  ;;  %vm1028_vm14 = vcmp.eq.f32.partialorder %v409_v60, 8.507059e+37  ;;  %v364_v15 = vand.u32 2147483647, %v933_v12 }
  0xe3   :  { %v603_v28 = vmul.f32 -1.442695, %v291_v23  ;;  %v328_v33 = vmul.f32 %v931_v11, %v327_v24  ;;  %v342_v37 = vsub.f32 1.0, %v341_v27  ;;  %v366_v16 = vand.u32 2147483648, %v933_v12  ;;  %vm1039_vm15 = vmor %vm345_vm5, %vm346_vm11 }
  0xe4   :  { %v942_v21 = vpop.eup %666  ;;  %v388_v48 = vmul.f32 %v935_v14, %v387_v35  ;;  %v412_v27 = vor.u32 1.1754944e-38, %v411_v2  ;;  %vm360_vm4 = vweird.f32 %v933_v12  ;;  %vm1064_vm5 = vcmp.eq.f32.partialorder %v364_v15, 8.507059e+37 }
  0xe5   :  { %v669_v22 = vpop.eup %668  ;;  %v401_v29 = vmul.f32 %v942_v21, %v927_v7  ;;  %v329_v46 = vadd.f32 %v931_v11, %v328_v33  ;;  %v343_v50 = vmul.f32 %v939_v19, %v342_v37  ;;  %vm406_vm12 = vweird.f32 %v942_v21 }
  0xe6   :  { %v946_v26 = vadd.f32 1.0, %v669_v22  ;;  %v953_v30 = vpop.eup %670  ;;  %v389_v0 = vadd.f32 %v935_v14, %v388_v48  ;;  %vm1050_vm1 = vmor %vm405_vm10, %vm406_vm12 }
  0xe7   :  { %v673_v32 = vpop.eup %672  ;;  %v402_v40 = vsub.f32 1.0, %v401_v29  ;;  %v356_v41 = vmul.f32 %v953_v30, %v933_v12  ;;  %v333_v56 = vsel %vm985_vm6, %v931_v11, %v329_v46  ;;  %v344_v4 = vadd.f32 %v939_v19, %v343_v50 }
  0xe8   :  { %674 = vrcp.f32 %v946_v26  ;;  %v959_v38 = vadd.f32 1.0, %v673_v32  ;;  %v338_v10 = vsel %vm965_vm2, %v337_v47, %v333_v56  ;;  %v393_v17 = vsel %vm1024_vm13, %v935_v14, %v389_v0 }
  0xe9   :  { %676 = vpow2.f32 %v603_v28  ;;  %v403_v54 = vmul.f32 %v942_v21, %v402_v40  ;;  %v357_v55 = vsub.f32 1.0, %v356_v41  ;;  %v348_v22 = vsel %vm1039_vm15, %v939_v19, %v344_v4 }
  0xea   :  { %678 = vrcp.f32 %v959_v38  ;;  %vm361_vm2 = vweird.f32 %v953_v30  ;;  %v424_v1 = vand.u32 2147483647, %v946_v26  ;;  %v426_v14 = vand.u32 2147483648, %v946_v26 }
  0xeb   :  { %v404_v6 = vadd.f32 %v942_v21, %v403_v54  ;;  %v358_v8 = vmul.f32 %v953_v30, %v357_v55  ;;  %vm420_vm3 = vweird.f32 %v946_v26  ;;  %v367_v29 = vor.u32 1.1754944e-38, %v366_v16  ;;  %vm1080_vm7 = vmor %vm360_vm4, %vm361_vm2 }
  0xec   :  { %vm425_vm10 = vcmp.eq.f32.partialorder %v424_v1, 8.507059e+37  ;;  %v427_v34 = vor.u32 1.1754944e-38, %v426_v14  ;;  %v379_v40 = vand.u32 2147483647, %v959_v38  ;;  %v381_v41 = vand.u32 2147483648, %v959_v38 }
  0xed   :  { %v408_v24 = vsel %vm1050_vm1, %v942_v21, %v404_v6  ;;  %v359_v25 = vadd.f32 %v953_v30, %v358_v8  ;;  %v398_v21 = vsel %vm990_vm8, %v397_v49, %v393_v17  ;;  %vm375_vm8 = vweird.f32 %v959_v38 }
  0xee   :  { %v972_v45 = vpop.eup %674  ;;  %v413_v12 = vsel %vm1028_vm14, %v412_v27, %v408_v24  ;;  %v445_v46 = vmul.f32 %v398_v21, %v338_v10  ;;  %v382_v50 = vor.u32 1.1754944e-38, %v381_v41  ;;  %vm380_vm15 = vcmp.eq.f32.partialorder %v379_v40, 8.507059e+37 }
  0xef   :  { %v416_v51 = vmul.f32 %v972_v45, %v946_v26  ;;  %v677_v52 = vpop.eup %676  ;;  %vm421_vm0 = vweird.f32 %v972_v45  ;;  %v353_v26 = vsel %vm994_vm9, %v352_v53, %v348_v22  ;;  %v363_v35 = vsel %vm1080_vm7, %v953_v30, %v359_v25 }
  0xf0   :  { %v999_v63 = vadd.f32 1.0, %v677_v52  ;;  %v1007_v3 = vpop.eup %678  ;;  %vm422_vm6 = vmor %vm420_vm3, %vm421_vm0  ;;  %v446_v43 = vmul.f32 %v413_v12, %v353_v26  ;;  %v368_v30 = vsel %vm1064_vm5, %v367_v29, %v363_v35 }
  0xf1   :  { %v417_v62 = vsub.f32 1.0, %v416_v51  ;;  %v371_v9 = vmul.f32 %v1007_v3, %v959_v38  ;;  %vm376_vm9 = vweird.f32 %v1007_v3 }
  0xf2   :  { %680 = vrcp.f32 %v999_v63  ;;  %v441_v42 = vand.u32 2147483648, %v999_v63  ;;  %vm377_vm12 = vmor %vm375_vm8, %vm376_vm9  ;;  %vm435_vm13 = vweird.f32 %v999_v63  ;;  %v449_v52 = vadd.f32 %v446_v43, %v445_v46 }
  0xf3   :  { %v418_v5 = vmul.f32 %v972_v45, %v417_v62  ;;  %v372_v20 = vsub.f32 1.0, %v371_v9 }
  0xf4   :  { %v442_v51 = vor.u32 1.1754944e-38, %v441_v42 }
  0xf5   :  { %v419_v18 = vadd.f32 %v972_v45, %v418_v5  ;;  %v373_v7 = vmul.f32 %v1007_v3, %v372_v20 }
  0xf7   :  { %v423_v31 = vsel %vm422_vm6, %v972_v45, %v419_v18  ;;  %v374_v36 = vadd.f32 %v1007_v3, %v373_v7  ;;  %v439_v45 = vand.u32 2147483647, %v999_v63 }
  0xf8   :  { %v681_v19 = vpop.eup %680  ;;  %v428_v39 = vsel %vm425_vm10, %v427_v34, %v423_v31 }
  0xf9   :  { %v431_v32 = vmul.f32 %v681_v19, %v999_v63  ;;  %vm436_vm11 = vweird.f32 %v681_v19  ;;  %v447_v47 = vmul.f32 %v428_v39, %v368_v30  ;;  %v378_v48 = vsel %vm377_vm12, %v1007_v3, %v374_v36  ;;  %v458_v63 = vld [vmem:[%s1109_s3] sm:$0x1]  ;;  %s487_s3 = sshll.u32 %s1110_s4, 4  ;;  %s488_s3 = int_to_ptr.hbm [resolvable:$true] %s487_s3 }
  0xfa   :  { %vm437_vm14 = vmor %vm435_vm13, %vm436_vm11  ;;  %vm440_vm0 = vcmp.eq.f32.partialorder %v439_v45, 8.507059e+37  ;;  %v383_v54 = vsel %vm380_vm15, %v382_v50, %v378_v48 }
  0xfb   :  { %v432_v37 = vsub.f32 1.0, %v431_v32  ;;  %v450_v57 = vadd.f32 %v449_v52, %v447_v47 }
  0xfd   :  { %v433_v44 = vmul.f32 %v681_v19, %v432_v37 }
  0xff   :  { %v434_v49 = vadd.f32 %v681_v19, %v433_v44 }
 0x101   :  { %v438_v53 = vsel %vm437_vm14, %v681_v19, %v434_v49 }
 0x102   :  { %v443_v55 = vsel %vm440_vm0, %v442_v51, %v438_v53 }
 0x103   :  { %v448_v58 = vmul.f32 %v443_v55, %v383_v54 }
 0x105   :  { %v451_v59 = vadd.f32 %v450_v57, %v448_v58 }
 0x107   :  { %v452_v38 = vrot.slane %v451_v59, 4 }
 0x109   :  { %v453_v60 = vadd.f32 %v452_v38, %v451_v59 }
 0x10b   :  { %v454_v62 = vrot.slane %v453_v60, 2 }
 0x10d   :  { %v455_v56 = vadd.f32 %v454_v62, %v453_v60 }
 0x10f   :  { %v456_v0 = vrot.slane %v455_v56, 1 }
 0x111   :  { %v457_v2 = vadd.f32 %v456_v0, %v455_v56 }
 0x113   :  { %v459_v3 = vadd.f32 %v458_v63, %v457_v2 }
 0x115   :  { %v604_v4 = vmul.f32 -1.442695, %v459_v3 }
 0x117   :  { %682 = vpow2.f32 %v604_v4 }
 0x11d   :  { %v683_v5 = vpop.eup %682 }
 0x11e   :  { %v463_v6 = vadd.f32 1.0, %v683_v5 }
 0x120   :  { %684 = vrcp.f32 %v463_v6  ;;  %v475_v11 = vand.u32 2147483648, %v463_v6  ;;  %v473_v15 = vand.u32 2147483647, %v463_v6  ;;  %vm469_vm2 = vweird.f32 %v463_v6 }
 0x122   :  { %v476_v17 = vor.u32 1.1754944e-38, %v475_v11  ;;  %vm474_vm4 = vcmp.eq.f32.partialorder %v473_v15, 8.507059e+37 }
 0x126   :  { %v685_v8 = vpop.eup %684 }
 0x127   :  { %v465_v9 = vmul.f32 %v685_v8, %v463_v6  ;;  %vm470_vm1 = vweird.f32 %v685_v8 }
 0x128   :  { %vm471_vm3 = vmor %vm469_vm2, %vm470_vm1 }
 0x129   :  { %v466_v10 = vsub.f32 1.0, %v465_v9 }
 0x12b   :  { %v467_v13 = vmul.f32 %v685_v8, %v466_v10 }
 0x12d   :  { %v468_v16 = vadd.f32 %v685_v8, %v467_v13 }
 0x12f   :  { %v472_v61 = vsel %vm471_vm3, %v685_v8, %v468_v16 }
 0x130   :  { %v477_v18 = vsel %vm474_vm4, %v476_v17, %v472_v61 }
 0x131   :  { %479 = vst [vmem:[#allocation2] sm:$0x1] %v477_v18 }
 0x132   :  { %490 = dma.vmem_to_hbm [thread:$0]  %s486_s22, 16, %s488_s3, [#allocation3]  }
 0x133   :  { %710 = dma.done.wait [#allocation3], 16  }
 0x134   :  { %711 = vsyncadd [#allocation3], 4294967280 }
 0x135   :  { %495 = vsyncpa [#allocation3], 1 }

</bundles_post_ra>
